<compile_context>
chip_gen: v7x
topology: tpu7x:2x2x1
jax: 0.10.0
libtpu: 0.0.40
codegen_flags: <defaults>
</compile_context>

<pallas_src>
import functools

import jax
import jax.numpy as jnp
from jax import lax
from jax.experimental import pallas as pl
from jax.experimental.pallas import tpu as pltpu


def _round_up(n: int, m: int) -> int:
    return ((n + m - 1) // m) * m


def mlp_kernel(x_ref, w1_ref, b1_ref, w2_ref, b2_ref, out_ref):
    # x_ref  : (tile_b, in_features)  -- native PyTorch data layout
    # w1_ref : (hidden, in_features)  -- PyTorch Linear layout, VMEM-resident
    # b1_ref : (hidden, 1)
    # w2_ref : (1, hidden)            -- PyTorch Linear layout
    # b2_ref : (1,) in SMEM           -- scalar bias
    # out_ref: (1, tile_b)            -- lane-dense output block

    # Hidden layer on the MXU: contract the feature axis of both operands:
    #   (hidden, in) . (tile_b, in)^T -> (hidden, tile_b)
    # Mosaic inserts the small x-block transpose; it hides under the tile DMA.
    h = lax.dot_general(
        w1_ref[...], x_ref[...],
        dimension_numbers=(((1,), (1,)), ((), ())),
        preferred_element_type=jnp.float32)
    h = jnp.maximum(h + b1_ref[...], 0.0)          # bias + ReLU on the VPU

    # Output layer (out_features == 1) on the (idle) MXU:
    #   (1, hidden) @ (hidden, tile_b) -> (1, tile_b), still lane-dense.
    y = jnp.dot(w2_ref[...], h, preferred_element_type=jnp.float32)
    out_ref[...] = (y + b2_ref[0]).astype(out_ref.dtype)


@functools.partial(jax.jit, static_argnames=("max_tile_b",))
def linear_regression_structure_forward(x, w1, b1, w2, b2, *, max_tile_b=8192):
    """Fused forward: relu(x @ w1.T + b1) @ w2.T + b2  (PyTorch weight layout).

    x  : (B, in_features)
    w1 : (hidden, in_features)   b1 : (hidden,)
    w2 : (1, hidden)             b2 : (1,)
    returns (B, 1)
    """
    B, in_features = x.shape
    hidden = w1.shape[0]
    out_features = w2.shape[0]
    assert out_features == 1 and w1.shape[1] == in_features

    # Lane-width batch tile; keep >=~8 grid steps at large B (v7x megacore +
    # DMA/compute overlap), capped so double-buffered VMEM stays modest.
    tile_b = min(max_tile_b, _round_up(pl.cdiv(B, 8), 128))
    B_pad = _round_up(B, tile_b)
    grid = (B_pad // tile_b,)

    # Cheap row-only pad (no transpose, no extra full HBM pass when B already
    # divides the tile).
    x_p = jnp.pad(x, ((0, B_pad - B), (0, 0))) if B_pad != B else x
    b1_col = b1.reshape(hidden, 1)
    b2_s = b2.reshape(1)

    itemsize = jnp.dtype(x.dtype).itemsize
    # VMEM budget for the chosen tile (lane-pad 32->128 on the x block,
    # sublane-pad 1->8 on the output block), double-buffered.
    x_buf = tile_b * 128 * itemsize
    o_buf = 8 * tile_b * itemsize
    w_buf = (hidden * 128 + hidden * 128 + 8 * 128) * itemsize
    vmem_needed = 2 * (x_buf + o_buf + w_buf) + (1 << 20)
    # Only override the default scoped limit when a big tile actually needs it
    # (v5e defaults to 16 MiB scoped VMEM).
    vmem_limit = vmem_needed if vmem_needed > (14 << 20) else None

    cost = pl.CostEstimate(
        flops=2 * B_pad * in_features * hidden    # layer 1 matmul
        + 2 * B_pad * hidden                      # bias + relu
        + 2 * B_pad * hidden,                     # layer 2 matmul
        transcendentals=0,
        bytes_accessed=(x_p.size + w1.size + b1.size + w2.size + b2.size
                        + B_pad) * itemsize,
    )

    out = pl.pallas_call(
        mlp_kernel,
        out_shape=jax.ShapeDtypeStruct((1, B_pad), x.dtype),
        grid=grid,
        in_specs=[
            # x in native layout, tiled along batch; double-buffered by Pallas.
            pl.BlockSpec((tile_b, in_features), lambda i: (i, 0),
                         memory_space=pltpu.MemorySpace.VMEM),
            # Weights/biases: constant block index -> VMEM-resident across grid.
            pl.BlockSpec((hidden, in_features), lambda i: (0, 0),
                         memory_space=pltpu.MemorySpace.VMEM),
            pl.BlockSpec((hidden, 1), lambda i: (0, 0),
                         memory_space=pltpu.MemorySpace.VMEM),
            pl.BlockSpec((out_features, hidden), lambda i: (0, 0),
                         memory_space=pltpu.MemorySpace.VMEM),
            # Scalar bias via SMEM (avoids a padded (8,128) VMEM tile + DMA).
            pl.BlockSpec(memory_space=pltpu.MemorySpace.SMEM),
        ],
        out_specs=pl.BlockSpec((1, tile_b), lambda i: (0, i),
                               memory_space=pltpu.MemorySpace.VMEM),
        compiler_params=pltpu.CompilerParams(
            dimension_semantics=("parallel",),   # v7x: shard tiles over 2 TCs
            vmem_limit_bytes=vmem_limit,
        ),
        cost_estimate=cost,
    )(x_p, w1, b1_col, w2, b2_s)

    # Back to the PyTorch output layout (B, 1); drop batch padding.
    return out[0, :B].reshape(B, out_features)


def init_params(key, in_features, hidden, out_features):
    """PyTorch nn.Linear default init (uniform +-1/sqrt(fan_in)), torch layout."""
    k1, k2, k3, k4 = jax.random.split(key, 4)
    lim1 = float(in_features) ** -0.5
    lim2 = float(hidden) ** -0.5
    w1 = jax.random.uniform(k1, (hidden, in_features), jnp.float32, -lim1, lim1)
    b1 = jax.random.uniform(k2, (hidden,), jnp.float32, -lim1, lim1)
    w2 = jax.random.uniform(k3, (out_features, hidden), jnp.float32, -lim2, lim2)
    b2 = jax.random.uniform(k4, (out_features,), jnp.float32, -lim2, lim2)
    return w1, b1, w2, b2


if __name__ == "__main__":
    key = jax.random.PRNGKey(0)
    kx, kp = jax.random.split(key)

    batch, in_features, hidden, out_features = 8, 32, 64, 1
    x = jax.random.normal(kx, (batch, in_features), jnp.float32)
    w1, b1, w2, b2 = init_params(kp, in_features, hidden, out_features)

    y = linear_regression_structure_forward(x, w1, b1, w2, b2)
    jax.block_until_ready(y)

    # Reference in plain JAX (same semantics as the torch Sequential).
    y_ref = jnp.maximum(x @ w1.T + b1, 0.0) @ w2.T + b2
    assert y.shape == (batch, out_features)
    assert jnp.allclose(y, y_ref, atol=1e-5, rtol=1e-5)

    print("KERNEL_OK")
</pallas_src>

<mosaic_0001>
module attributes {stable_mosaic.version = 11 : i64} {
  func.func @mlp_kernel(%arg0: i32, %arg1: memref<128x32xf32, #tpu.memory_space<vmem>>, %arg2: memref<64x32xf32, #tpu.memory_space<vmem>>, %arg3: memref<64x1xf32, #tpu.memory_space<vmem>>, %arg4: memref<1x64xf32, #tpu.memory_space<vmem>>, %arg5: memref<1xf32, #tpu.memory_space<smem>>, %arg6: memref<1x128xf32, #tpu.memory_space<vmem>>) attributes {dimension_semantics = [#tpu.dimension_semantics<parallel>], iteration_bounds = array<i64: 1>, scalar_prefetch = 0 : i64, scratch_operands = 0 : i64, tpu.core_type = #tpu.core_type<tc>, window_params = [{transform_indices = @transform_0, window_bounds = array<i64: 128, 32>}, {pipeline_mode = #tpu.pipeline_mode<synchronous>, transform_indices = @transform_1, window_bounds = array<i64: 64, 32>}, {pipeline_mode = #tpu.pipeline_mode<synchronous>, transform_indices = @transform_2, window_bounds = array<i64: 64, 1>}, {pipeline_mode = #tpu.pipeline_mode<synchronous>, transform_indices = @transform_3, window_bounds = array<i64: 1, 64>}, {transform_indices = @transform_4, window_bounds = array<i64: 1>}, {transform_indices = @transform_5, window_bounds = array<i64: 1, 128>}]} {
    %c0 = arith.constant 0 : index
    %c0_0 = arith.constant 0 : index
    %0 = vector.load %arg2[%c0, %c0_0] : memref<64x32xf32, #tpu.memory_space<vmem>>, vector<64x32xf32>
    %c0_1 = arith.constant 0 : index
    %c0_2 = arith.constant 0 : index
    %1 = vector.load %arg1[%c0_1, %c0_2] : memref<128x32xf32, #tpu.memory_space<vmem>>, vector<128x32xf32>
    %cst = arith.constant dense<0.000000e+00> : vector<64x128xf32>
    %2 = tpu.matmul %0, %1, %cst {dimension_numbers = #tpu.dot_dimension_numbers<[1], [1], [0], [0], [0, 0, 1, 0], [], []>} : vector<64x32xf32>, vector<128x32xf32>, vector<64x128xf32> -> vector<64x128xf32>
    %c0_3 = arith.constant 0 : index
    %c0_4 = arith.constant 0 : index
    %3 = vector.load %arg3[%c0_3, %c0_4] : memref<64x1xf32, #tpu.memory_space<vmem>>, vector<64x1xf32>
    %4 = vector.broadcast %3 : vector<64x1xf32> to vector<64x128xf32>
    %5 = arith.addf %2, %4 : vector<64x128xf32>
    %cst_5 = arith.constant 0.000000e+00 : f32
    %6 = vector.broadcast %cst_5 : f32 to vector<64x128xf32>
    %7 = arith.maximumf %5, %6 : vector<64x128xf32>
    %c0_6 = arith.constant 0 : index
    %c0_7 = arith.constant 0 : index
    %8 = vector.load %arg4[%c0_6, %c0_7] : memref<1x64xf32, #tpu.memory_space<vmem>>, vector<1x64xf32>
    %cst_8 = arith.constant dense<0.000000e+00> : vector<1x128xf32>
    %9 = tpu.matmul %8, %7, %cst_8 {dimension_numbers = #tpu.dot_dimension_numbers<[1], [0], [0], [1], [0, 0, 1, 1], [], []>} : vector<1x64xf32>, vector<64x128xf32>, vector<1x128xf32> -> vector<1x128xf32>
    %c0_9 = arith.constant 0 : index
    %10 = memref.load %arg5[%c0_9] : memref<1xf32, #tpu.memory_space<smem>>
    %11 = vector.broadcast %10 : f32 to vector<1x128xf32>
    %12 = arith.addf %9, %11 : vector<1x128xf32>
    %c0_10 = arith.constant 0 : index
    %c0_11 = arith.constant 0 : index
    %13 = vector.load %arg6[%c0_10, %c0_11] : memref<1x128xf32, #tpu.memory_space<vmem>>, vector<1x128xf32>
    tpu.vector_store %arg6[%c0_10, %c0_11], %12 {strides = array<i32>} : memref<1x128xf32, #tpu.memory_space<vmem>>, vector<1x128xf32>,
    return
  }
  func.func @transform_0(%arg0: i32) -> (i32, i32) {
    %c0_i32 = arith.constant 0 : i32
    %c0_i32_0 = arith.constant 0 : i32
    return %arg0, %c0_i32 : i32, i32
  }
  func.func @transform_1(%arg0: i32) -> (i32, i32) {
    %c0_i32 = arith.constant 0 : i32
    %c0_i32_0 = arith.constant 0 : i32
    %c0_i32_1 = arith.constant 0 : i32
    return %c0_i32, %c0_i32_0 : i32, i32
  }
  func.func @transform_2(%arg0: i32) -> (i32, i32) {
    %c0_i32 = arith.constant 0 : i32
    %c0_i32_0 = arith.constant 0 : i32
    %c0_i32_1 = arith.constant 0 : i32
    return %c0_i32, %c0_i32_0 : i32, i32
  }
  func.func @transform_3(%arg0: i32) -> (i32, i32) {
    %c0_i32 = arith.constant 0 : i32
    %c0_i32_0 = arith.constant 0 : i32
    %c0_i32_1 = arith.constant 0 : i32
    return %c0_i32, %c0_i32_0 : i32, i32
  }
  func.func @transform_4(%arg0: i32) -> i32 {
    %c0_i32 = arith.constant 0 : i32
    %c0_i32_0 = arith.constant 0 : i32
    return %c0_i32 : i32
  }
  func.func @transform_5(%arg0: i32) -> (i32, i32) {
    %c0_i32 = arith.constant 0 : i32
    %c0_i32_0 = arith.constant 0 : i32
    return %c0_i32, %arg0 : i32, i32
  }
}

</mosaic_0001>

<bundles_post_ra>
// kernel: linear_regression_structure_forward.1
= control target key start
LH: loop header
LB: loop body
LE: loop exit
PB: predicated region body
PF: predicated region fallthrough
CT: control target
= control target key end

     0   :  { %vm93_vm0 = vcmask 261120   ;;  %v548_v3 = vmov 0   ;;  %v549_v42 = vmov 0.0|0.0   ;;  %vm550_vm2 = vmmov 0   ;;  %s733_s0 = inlined_call_operand.vmem [shape: f32[128,32], index: 0, kind: input, shape index: {}]   ;;  %s734_s1 = inlined_call_operand.vmem [shape: f32[64,32], index: 1, kind: input, shape index: {}]   ;;  %s735_s2 = inlined_call_operand.vmem [shape: f32[64,1], index: 2, kind: input, shape index: {}]   ;;  %s736_s3 = inlined_call_operand.vmem [shape: f32[1,64], index: 3, kind: input, shape index: {}]   ;;  %s737_s4 = inlined_call_operand.<no memory space> [shape: f32[1], index: 4, kind: input, shape index: {}]   ;;  %s738_s5 = inlined_call_operand.vmem [shape: f32[1,128], index: 5, kind: output, shape index: {}]  }
   0x1   :  { %v29_v0 = vld [vmem:[%s733_s0] sm:$0xff]  ;;  %v30_v1 = vld [vmem:[%s733_s0 + $0x8] sm:$0xff]  ;;  %vm590_vm1 = vmpackc.low %vm93_vm0, %vm93_vm0  ;;  %546 = vset.pattern.permute.xlu0 %v548_v3  ;;  %547 = vset.pattern.permute.xlu1 %v548_v3  ;;  %v551_v43 = vmov 0.0   ;;  %vm282_vm3 = vcmask 523264  }
   0x2   :  { %v482_v4 = vpack.c.bf16 %v30_v1, %v29_v0  ;;  %v31_v5 = vld [vmem:[%s733_s0 + $0x10] sm:$0xff]  ;;  %v32_v6 = vld [vmem:[%s733_s0 + $0x18] sm:$0xff]  ;;  %v21_v8 = vld [vmem:[%s734_s1] sm:$0xff]  ;;  %530 = vmatprep.subr.bf16.mxu1 %v549_v42  ;;  %479 = vmatprep.mubr.msk.f32.mxu1 %vm550_vm2, %v551_v43 }
   0x3   :  { %v488_v7 = vpack.c.bf16 %v32_v6, %v31_v5  ;;  %v33_v9 = vld [vmem:[%s733_s0 + $0x20] sm:$0xff]  ;;  %v34_v10 = vld [vmem:[%s733_s0 + $0x28] sm:$0xff]  ;;  %451 = vmatprep.mubr.msk.f32.mxu0 %vm93_vm0, %v21_v8  ;;  %v47_v12 = vld [vmem:[%s735_s2 + $0x10] sm:$0xff] }
   0x4   :  { %484 = vmatprep.subr.msk.bf16.mxu0 %vm590_vm1, %v482_v4  ;;  %v45_v11 = vld [vmem:[%s735_s2] sm:$0xff]  ;;  %v494_v13 = vpack.c.bf16 %v34_v10, %v33_v9  ;;  %65 = vperm.xlu1 %547, %v47_v12   ;;  %v46_v14 = vld [vmem:[%s735_s2 + $0x8] sm:$0xff]  ;;  %v48_v15 = vld [vmem:[%s735_s2 + $0x18] sm:$0xff] }
   0x5   :  { %487 = vmatpush3.bf16.xpose.msk.msra.mxu0 %vm590_vm1, %v482_v4  ;;  %55 = vperm.xlu0 %546, %v45_v11   ;;  %v35_v16 = vld [vmem:[%s733_s0 + $0x30] sm:$0xff]  ;;  %v36_v17 = vld [vmem:[%s733_s0 + $0x38] sm:$0xff]  ;;  %v49_v18 = vld [vmem:[%s735_s2 + $0x20] sm:$0xff] }
   0x6   :  { %490 = vmatprep.subr.msk.bf16.mxu0 %vm590_vm1, %v488_v7  ;;  %v50_v19 = vld [vmem:[%s735_s2 + $0x28] sm:$0xff]  ;;  %v500_v20 = vpack.c.bf16 %v36_v17, %v35_v16  ;;  %v51_v21 = vld [vmem:[%s735_s2 + $0x30] sm:$0xff]  ;;  %v52_v22 = vld [vmem:[%s735_s2 + $0x38] sm:$0xff]  ;;  %v281_v17 = vstv %s737_s4 }
   0x7   :  { %v37_v23 = vld [vmem:[%s733_s0 + $0x40] sm:$0xff]  ;;  %v38_v24 = vld [vmem:[%s733_s0 + $0x48] sm:$0xff]  ;;  %v39_v26 = vld [vmem:[%s733_s0 + $0x50] sm:$0xff] }
   0x8   :  { %70 = vperm.xlu1 %547, %v48_v15   ;;  %v506_v25 = vpack.c.bf16 %v38_v24, %v37_v23  ;;  %v40_v27 = vld [vmem:[%s733_s0 + $0x58] sm:$0xff]  ;;  %v41_v29 = vld [vmem:[%s733_s0 + $0x60] sm:$0xff]  ;;  %v42_v30 = vld [vmem:[%s733_s0 + $0x68] sm:$0xff] }
   0x9   :  { %60 = vperm.xlu0 %546, %v46_v14   ;;  %v512_v28 = vpack.c.bf16 %v40_v27, %v39_v26  ;;  %v518_v31 = vpack.c.bf16 %v42_v30, %v41_v29  ;;  %v43_v32 = vld [vmem:[%s733_s0 + $0x70] sm:$0xff]  ;;  %v44_v33 = vld [vmem:[%s733_s0 + $0x78] sm:$0xff]  ;;  %v22_v35 = vld [vmem:[%s734_s1 + $0x8] sm:$0xff] }
   0xa   :  { %v524_v34 = vpack.c.bf16 %v44_v33, %v43_v32  ;;  %v23_v36 = vld [vmem:[%s734_s1 + $0x10] sm:$0xff]  ;;  %v24_v37 = vld [vmem:[%s734_s1 + $0x18] sm:$0xff]  ;;  %v25_v38 = vld [vmem:[%s734_s1 + $0x20] sm:$0xff] }
   0xb   :  { %v26_v39 = vld [vmem:[%s734_s1 + $0x28] sm:$0xff]  ;;  %v27_v40 = vld [vmem:[%s734_s1 + $0x30] sm:$0xff]  ;;  %v28_v41 = vld [vmem:[%s734_s1 + $0x38] sm:$0xff] }
   0xc   :  { %80 = vperm.xlu1 %547, %v50_v19   ;;  %v279_v16 = vld [vmem:[%s736_s3] sm:$0x1] }
   0xd   :  { %493 = vmatpush3.bf16.xpose.msk.msra.mxu0 %vm590_vm1, %v488_v7  ;;  %75 = vperm.xlu0 %546, %v49_v18  }
   0xe   :  { %496 = vmatprep.subr.msk.bf16.mxu0 %vm590_vm1, %v494_v13 }
  0x10   :  { %90 = vperm.xlu1 %547, %v52_v22  }
  0x11   :  { %85 = vperm.xlu0 %546, %v51_v21  }
  0x15   :  { %499 = vmatpush3.bf16.xpose.msk.msra.mxu0 %vm590_vm1, %v494_v13 }
  0x16   :  { %502 = vmatprep.subr.msk.bf16.mxu0 %vm590_vm1, %v500_v20 }
  0x1d   :  { %505 = vmatpush3.bf16.xpose.msk.msra.mxu0 %vm590_vm1, %v500_v20 }
  0x1e   :  { %508 = vmatprep.subr.msk.bf16.mxu0 %vm590_vm1, %v506_v25 }
  0x25   :  { %511 = vmatpush3.bf16.xpose.msk.msra.mxu0 %vm590_vm1, %v506_v25 }
  0x26   :  { %514 = vmatprep.subr.msk.bf16.mxu0 %vm590_vm1, %v512_v28 }
  0x2d   :  { %517 = vmatpush3.bf16.xpose.msk.msra.mxu0 %vm590_vm1, %v512_v28 }
  0x2e   :  { %520 = vmatprep.subr.msk.bf16.mxu0 %vm590_vm1, %v518_v31 }
  0x35   :  { %523 = vmatpush3.bf16.xpose.msk.msra.mxu0 %vm590_vm1, %v518_v31 }
  0x36   :  { %526 = vmatprep.subr.msk.bf16.mxu0 %vm590_vm1, %v524_v34 }
  0x3d   :  { %529 = vmatpush3.bf16.xpose.msk.msra.mxu0 %vm590_vm1, %v524_v34 }
  0x44   :  { %452 = vmatmul.mubr.msk.f32.vlgmr.msra.gmra.mrb[0].mxu0 %vm93_vm0, %v22_v35 }
  0x45   :  { %454 = vmatprep.mubr.msk.f32.mxu0 %vm93_vm0, %v23_v36 }
  0x48   :  { %455 = vmatmul.mubr.msk.f32.gmra.mrb[2].mxu0 %vm93_vm0, %v24_v37 }
  0x49   :  { %457 = vmatprep.mubr.msk.f32.mxu0 %vm93_vm0, %v25_v38 }
  0x4c   :  { %458 = vmatmul.mubr.msk.f32.gmra.mrb[4].mxu0 %vm93_vm0, %v26_v39 }
  0x4d   :  { %460 = vmatprep.mubr.msk.f32.mxu0 %vm93_vm0, %v27_v40 }
  0x50   :  { %461 = vmatmul.mubr.msk.f32.gmra.mrb[6].mxu0 %vm93_vm0, %v28_v41 }
  0x83   :  { %v66_v45 = vpop.permute.xlu1 %65 }
  0x84   :  { %v56_v44 = vpop.permute.xlu0 %55 }
  0x87   :  { %v71_v47 = vpop.permute.xlu1 %70 }
  0x88   :  { %v61_v46 = vpop.permute.xlu0 %60 }
  0x8b   :  { %v81_v57 = vpop.permute.xlu1 %80 }
  0x8c   :  { %v76_v60 = vpop.permute.xlu0 %75 }
  0x8f   :  { %v91_v5 = vpop.permute.xlu1 %90 }
  0x90   :  { %v86_v8 = vpop.permute.xlu0 %85 }
 0x117   :  { %v453_v48 = vpop.f32.mrb[0].mxu0 }
 0x118   :  { %v238_v49 = vadd.f32 %v453_v48, %v61_v46  ;;  %v232_v50 = vpop.f32.mrb[1].mxu0 }
 0x119   :  { %v233_v51 = vadd.f32 %v232_v50, %v56_v44 }
 0x11a   :  { %v272_v52 = vmax.f32 %v238_v49, 0.0 }
 0x11b   :  { %v271_v53 = vmax.f32 %v233_v51, 0.0  ;;  %v456_v54 = vpop.f32.mrb[2].mxu0 }
 0x11c   :  { %v248_v55 = vadd.f32 %v456_v54, %v71_v47  ;;  %v242_v56 = vpop.f32.mrb[3].mxu0 }
 0x11d   :  { %v243_v58 = vadd.f32 %v242_v56, %v66_v45  ;;  %v531_v59 = vpack.c.bf16 %v272_v52, %v271_v53 }
 0x11e   :  { %v274_v61 = vmax.f32 %v248_v55, 0.0 }
 0x11f   :  { %v273_v62 = vmax.f32 %v243_v58, 0.0  ;;  %v459_v63 = vpop.f32.mrb[4].mxu0  ;;  %532 = vmatpush3.bf16.msra.mxu1 %v531_v59 }
 0x120   :  { %v258_v0 = vadd.f32 %v459_v63, %v81_v57  ;;  %v252_v1 = vpop.f32.mrb[5].mxu0  ;;  %533 = vmatprep.subr.bf16.mxu1 %v549_v42 }
 0x121   :  { %v534_v2 = vpack.c.bf16 %v274_v61, %v273_v62  ;;  %v253_v3 = vadd.f32 %v252_v1, %v76_v60 }
 0x122   :  { %v276_v4 = vmax.f32 %v258_v0, 0.0 }
 0x123   :  { %v275_v6 = vmax.f32 %v253_v3, 0.0  ;;  %v462_v7 = vpop.f32.mrb[6].mxu0  ;;  %535 = vmatpush3.bf16.msra.mxu1 %v534_v2 }
 0x124   :  { %v268_v9 = vadd.f32 %v462_v7, %v91_v5  ;;  %v262_v10 = vpop.f32.mrb[7].mxu0  ;;  %536 = vmatprep.subr.bf16.mxu1 %v549_v42 }
 0x125   :  { %v537_v11 = vpack.c.bf16 %v276_v4, %v275_v6  ;;  %v263_v12 = vadd.f32 %v262_v10, %v86_v8 }
 0x126   :  { %v278_v13 = vmax.f32 %v268_v9, 0.0 }
 0x127   :  { %v277_v14 = vmax.f32 %v263_v12, 0.0  ;;  %538 = vmatpush3.bf16.msra.mxu1 %v537_v11 }
 0x128   :  { %539 = vmatprep.subr.bf16.mxu1 %v549_v42 }
 0x129   :  { %v540_v15 = vpack.c.bf16 %v278_v13, %v277_v14 }
 0x12b   :  { %541 = vmatpush3.bf16.msra.mxu1 %v540_v15 }
 0x12e   :  { %480 = vmatmul.mubr.msk.f32.vlgmr.msra.gmra.mrb[0].mxu1 %vm282_vm3, %v279_v16 }
 0x201   :  { %v352_v18 = vpop.f32.mrb[0].mxu1 }
 0x202   :  { %v353_v19 = vadd.f32 %v352_v18, %v281_v17  ;;  %v481_v20 = vpop.f32.mrb[1].mxu1 }
 0x204   :  { %356 = vst [vmem:[%s738_s5] sm:$0x1] %v353_v19 }

</bundles_post_ra>
